<compile_context>
chip_gen: v5e
topology: v5e:2x2
jax: 0.10.0
libtpu: 0.0.40
codegen_flags: <defaults>
</compile_context>

<pallas_src>
import functools

import jax
import jax.numpy as jnp
from jax.experimental import pallas as pl
from jax.experimental.pallas import tpu as pltpu

HIDDEN = 256
LANE = 128
SUBLANE = 8


def _round_up(x, m):
    return (x + m - 1) // m * m


def actor_kernel(x_ref, w1_ref, b1_ref, w2_ref, b2_ref, wh_ref, bh_ref,
                 out_ref, *, action_dim):
    """One batch tile of the Actor forward.

    x:  (TB, S)          w1: (S, 256)    b1: (1, 256)
                         w2: (256, 256)  b2: (1, 256)
        fused heads      wh: (256, P)    bh: (1, P)     P = pad(2*A, 128)
    out: (TB, P)   cols [0, A) = mean, cols [A, 2A) = std = exp(log_std)
    """
    cdt = w1_ref.dtype  # compute dtype of the matmuls (f32 or bf16)
    x = x_ref[...].astype(cdt)

    # fc1 + relu  (MXU matmul, f32 accumulation; bias/relu in f32 on the VPU)
    h1 = jnp.dot(x, w1_ref[...], preferred_element_type=jnp.float32) + b1_ref[...]
    h1 = jnp.maximum(h1, 0.0)

    # fc2 + relu
    h2 = jnp.dot(h1.astype(cdt), w2_ref[...],
                 preferred_element_type=jnp.float32) + b2_ref[...]
    h2 = jnp.maximum(h2, 0.0)

    # fused mean || log_std head (single lane-dense matmul + store)
    head = jnp.dot(h2.astype(cdt), wh_ref[...],
                   preferred_element_type=jnp.float32) + bh_ref[...]

    # std = exp(log_std) only on the log_std half of the fused slab (exp -> EUP).
    col = jax.lax.broadcasted_iota(jnp.int32, head.shape, 1)
    is_std = (col >= action_dim) & (col < 2 * action_dim)
    out_ref[...] = jnp.where(is_std, jnp.exp(head), head).astype(out_ref.dtype)


def init_actor_params(key, state_dim, action_dim):
    """Deterministic init mirroring nn.Linear default (U[-1/sqrt(fan_in), 1/sqrt(fan_in)]).
    Weights stored as (in_features, out_features)."""
    def linear(k, fan_in, fan_out):
        kw, kb = jax.random.split(k)
        bound = 1.0 / jnp.sqrt(fan_in)
        w = jax.random.uniform(kw, (fan_in, fan_out), jnp.float32, -bound, bound)
        b = jax.random.uniform(kb, (1, fan_out), jnp.float32, -bound, bound)
        return w, b

    k1, k2, k3, k4 = jax.random.split(key, 4)
    w1, b1 = linear(k1, state_dim, HIDDEN)
    w2, b2 = linear(k2, HIDDEN, HIDDEN)
    wm, bm = linear(k3, HIDDEN, action_dim)
    ws, bs = linear(k4, HIDDEN, action_dim)
    return dict(w1=w1, b1=b1, w2=w2, b2=b2, wm=wm, bm=bm, ws=ws, bs=bs)


def prepare_actor_params(p, *, compute_dtype=jnp.float32):
    """Fuse mean/log_std heads into one lane-padded weight, cast matmul weights
    to `compute_dtype` (bf16 on v6e/v7x for MXU throughput + halved VMEM/HBM)."""
    action_dim = p["wm"].shape[1]
    head_pad = max(LANE, _round_up(2 * action_dim, LANE))

    wh = jnp.zeros((HIDDEN, head_pad), jnp.float32)
    wh = wh.at[:, :action_dim].set(p["wm"]).at[:, action_dim:2 * action_dim].set(p["ws"])
    bh = jnp.zeros((1, head_pad), jnp.float32)
    bh = bh.at[:, :action_dim].set(p["bm"]).at[:, action_dim:2 * action_dim].set(p["bs"])

    return dict(
        w1=p["w1"].astype(compute_dtype), b1=p["b1"],
        w2=p["w2"].astype(compute_dtype), b2=p["b2"],
        wh=wh.astype(compute_dtype), bh=bh,
        action_dim=action_dim, head_pad=head_pad,
    )


def actor_forward(state, prepared, *, block_b=256):
    """Batch-tiled Actor forward. Returns (mean, std), each (B, action_dim) f32."""
    B, S = state.shape
    A = prepared["action_dim"]
    P = prepared["head_pad"]

    # Batch tile: 256 rows feeds the 2x256^2 MXU (v6e/v7x) and is a 128-multiple
    # for v5e's 4x128^2 MXU; shrink (sublane-aligned) for tiny batches.
    tb = _round_up(min(block_b, _round_up(B, SUBLANE)), SUBLANE)
    Bp = _round_up(B, tb)
    if Bp != B:
        state = jnp.pad(state, ((0, Bp - B), (0, 0)))

    const = lambda i: (0, 0)  # weights/biases: same block every step -> VMEM-resident

    out = pl.pallas_call(
        functools.partial(actor_kernel, action_dim=A),
        out_shape=jax.ShapeDtypeStruct((Bp, P), jnp.float32),
        grid=(Bp // tb,),
        in_specs=[
            pl.BlockSpec((tb, S), lambda i: (i, 0)),      # state tile
            pl.BlockSpec((S, HIDDEN), const),             # w1
            pl.BlockSpec((1, HIDDEN), const),             # b1
            pl.BlockSpec((HIDDEN, HIDDEN), const),        # w2
            pl.BlockSpec((1, HIDDEN), const),             # b2
            pl.BlockSpec((HIDDEN, P), const),             # fused head weights
            pl.BlockSpec((1, P), const),                  # fused head bias
        ],
        out_specs=pl.BlockSpec((tb, P), lambda i: (i, 0)),
        compiler_params=pltpu.CompilerParams(
            dimension_semantics=("parallel",)),           # shard batch tiles across TCs (v7x)
    )(state, prepared["w1"], prepared["b1"], prepared["w2"], prepared["b2"],
      prepared["wh"], prepared["bh"])

    mean = out[:B, :A]
    std = out[:B, A:2 * A]
    return mean, std


def actor_forward_ref(state, p):
    """Pure-JAX reference matching the PyTorch module (f32)."""
    h1 = jnp.maximum(state @ p["w1"] + p["b1"], 0.0)
    h2 = jnp.maximum(h1 @ p["w2"] + p["b2"], 0.0)
    mean = h2 @ p["wm"] + p["bm"]
    std = jnp.exp(h2 @ p["ws"] + p["bs"])
    return mean, std


if __name__ == "__main__":
    key = jax.random.PRNGKey(0)
    k_params, k_state, k_big = jax.random.split(key, 3)

    batch = 2
    state_dim = 16
    action_dim = 4
    max_action = 1.0  # only used by .sample(), not forward()
    # TODO(synk): .sample() (Normal.rsample + tanh squash * max_action) is not part of forward(); not implemented in-kernel.

    params = init_actor_params(k_params, state_dim, action_dim)
    state = jax.random.normal(k_state, (batch, state_dim), jnp.float32)
    mean_ref, std_ref = actor_forward_ref(state, params)

    # --- f32 path: exact match to the module semantics ---
    prep_f32 = prepare_actor_params(params, compute_dtype=jnp.float32)
    mean, std = actor_forward(state, prep_f32)
    jax.block_until_ready((mean, std))
    assert mean.shape == (batch, action_dim) and std.shape == (batch, action_dim)
    assert jnp.allclose(mean, mean_ref, atol=1e-5, rtol=1e-5)
    assert jnp.allclose(std, std_ref, atol=1e-5, rtol=1e-5)
    assert bool(jnp.all(std > 0))

    # --- bf16-weight path (production v6e/v7x config), looser tolerance ---
    prep_bf16 = prepare_actor_params(params, compute_dtype=jnp.bfloat16)
    mean16, std16 = actor_forward(state, prep_bf16)
    jax.block_until_ready((mean16, std16))
    assert jnp.allclose(mean16, mean_ref, atol=1e-1, rtol=1e-1)
    assert jnp.allclose(std16, std_ref, atol=1e-1, rtol=1e-1)

    # --- larger, non-tile-aligned batch: exercises the grid + padding path ---
    big_B = 300
    big_state = jax.random.normal(k_big, (big_B, state_dim), jnp.float32)
    mean_b, std_b = actor_forward(big_state, prep_f32)
    jax.block_until_ready((mean_b, std_b))
    mean_b_ref, std_b_ref = actor_forward_ref(big_state, params)
    assert mean_b.shape == (big_B, action_dim) and std_b.shape == (big_B, action_dim)
    assert jnp.allclose(mean_b, mean_b_ref, atol=1e-4, rtol=1e-4)
    assert jnp.allclose(std_b, std_b_ref, atol=1e-4, rtol=1e-4)

    print("KERNEL_OK")
</pallas_src>

<mosaic_0001>
module attributes {stable_mosaic.version = 11 : i64} {
  func.func @actor_kernel(%arg0: i32, %arg1: memref<8x16xf32, #tpu.memory_space<vmem>>, %arg2: memref<16x256xf32, #tpu.memory_space<vmem>>, %arg3: memref<1x256xf32, #tpu.memory_space<vmem>>, %arg4: memref<256x256xf32, #tpu.memory_space<vmem>>, %arg5: memref<1x256xf32, #tpu.memory_space<vmem>>, %arg6: memref<256x128xf32, #tpu.memory_space<vmem>>, %arg7: memref<1x128xf32, #tpu.memory_space<vmem>>, %arg8: memref<8x128xf32, #tpu.memory_space<vmem>>) attributes {dimension_semantics = [#tpu.dimension_semantics<parallel>], iteration_bounds = array<i64: 1>, scalar_prefetch = 0 : i64, scratch_operands = 0 : i64, tpu.core_type = #tpu.core_type<tc>, window_params = [{transform_indices = @transform_0, window_bounds = array<i64: 8, 16>}, {pipeline_mode = #tpu.pipeline_mode<synchronous>, transform_indices = @transform_1, window_bounds = array<i64: 16, 256>}, {pipeline_mode = #tpu.pipeline_mode<synchronous>, transform_indices = @transform_2, window_bounds = array<i64: 1, 256>}, {pipeline_mode = #tpu.pipeline_mode<synchronous>, transform_indices = @transform_3, window_bounds = array<i64: 256, 256>}, {pipeline_mode = #tpu.pipeline_mode<synchronous>, transform_indices = @transform_4, window_bounds = array<i64: 1, 256>}, {pipeline_mode = #tpu.pipeline_mode<synchronous>, transform_indices = @transform_5, window_bounds = array<i64: 256, 128>}, {pipeline_mode = #tpu.pipeline_mode<synchronous>, transform_indices = @transform_6, window_bounds = array<i64: 1, 128>}, {transform_indices = @transform_7, window_bounds = array<i64: 8, 128>}]} {
    %c0 = arith.constant 0 : index
    %c0_0 = arith.constant 0 : index
    %0 = vector.load %arg1[%c0, %c0_0] : memref<8x16xf32, #tpu.memory_space<vmem>>, vector<8x16xf32>
    %c0_1 = arith.constant 0 : index
    %c0_2 = arith.constant 0 : index
    %1 = vector.load %arg2[%c0_1, %c0_2] : memref<16x256xf32, #tpu.memory_space<vmem>>, vector<16x256xf32>
    %cst = arith.constant dense<0.000000e+00> : vector<8x256xf32>
    %2 = tpu.matmul %0, %1, %cst {dimension_numbers = #tpu.dot_dimension_numbers<[1], [0], [0], [1], [0, 0, 1, 1], [], []>} : vector<8x16xf32>, vector<16x256xf32>, vector<8x256xf32> -> vector<8x256xf32>
    %c0_3 = arith.constant 0 : index
    %c0_4 = arith.constant 0 : index
    %3 = vector.load %arg3[%c0_3, %c0_4] : memref<1x256xf32, #tpu.memory_space<vmem>>, vector<1x256xf32>
    %4 = vector.broadcast %3 : vector<1x256xf32> to vector<8x256xf32>
    %5 = arith.addf %2, %4 : vector<8x256xf32>
    %cst_5 = arith.constant 0.000000e+00 : f32
    %6 = vector.broadcast %cst_5 : f32 to vector<8x256xf32>
    %7 = arith.maximumf %5, %6 : vector<8x256xf32>
    %c0_6 = arith.constant 0 : index
    %c0_7 = arith.constant 0 : index
    %8 = vector.load %arg4[%c0_6, %c0_7] : memref<256x256xf32, #tpu.memory_space<vmem>>, vector<256x256xf32>
    %cst_8 = arith.constant dense<0.000000e+00> : vector<8x256xf32>
    %9 = tpu.matmul %7, %8, %cst_8 {dimension_numbers = #tpu.dot_dimension_numbers<[1], [0], [0], [1], [0, 0, 1, 1], [], []>} : vector<8x256xf32>, vector<256x256xf32>, vector<8x256xf32> -> vector<8x256xf32>
    %c0_9 = arith.constant 0 : index
    %c0_10 = arith.constant 0 : index
    %10 = vector.load %arg5[%c0_9, %c0_10] : memref<1x256xf32, #tpu.memory_space<vmem>>, vector<1x256xf32>
    %11 = vector.broadcast %10 : vector<1x256xf32> to vector<8x256xf32>
    %12 = arith.addf %9, %11 : vector<8x256xf32>
    %cst_11 = arith.constant 0.000000e+00 : f32
    %13 = vector.broadcast %cst_11 : f32 to vector<8x256xf32>
    %14 = arith.maximumf %12, %13 : vector<8x256xf32>
    %c0_12 = arith.constant 0 : index
    %c0_13 = arith.constant 0 : index
    %15 = vector.load %arg6[%c0_12, %c0_13] : memref<256x128xf32, #tpu.memory_space<vmem>>, vector<256x128xf32>
    %cst_14 = arith.constant dense<0.000000e+00> : vector<8x128xf32>
    %16 = tpu.matmul %14, %15, %cst_14 {dimension_numbers = #tpu.dot_dimension_numbers<[1], [0], [0], [1], [0, 0, 1, 1], [], []>} : vector<8x256xf32>, vector<256x128xf32>, vector<8x128xf32> -> vector<8x128xf32>
    %c0_15 = arith.constant 0 : index
    %c0_16 = arith.constant 0 : index
    %17 = vector.load %arg7[%c0_15, %c0_16] : memref<1x128xf32, #tpu.memory_space<vmem>>, vector<1x128xf32>
    %18 = vector.broadcast %17 : vector<1x128xf32> to vector<8x128xf32>
    %19 = arith.addf %16, %18 : vector<8x128xf32>
    %20 = tpu.iota {dimensions = array<i32: 1>} : vector<8x128xi32>
    %c4_i32 = arith.constant 4 : i32
    %21 = vector.broadcast %c4_i32 : i32 to vector<8x128xi32>
    %22 = arith.cmpi sge, %20, %21 : vector<8x128xi32>
    %c8_i32 = arith.constant 8 : i32
    %23 = vector.broadcast %c8_i32 : i32 to vector<8x128xi32>
    %24 = arith.cmpi slt, %20, %23 : vector<8x128xi32>
    %25 = arith.andi %22, %24 : vector<8x128xi1>
    %26 = math.exp %19 : vector<8x128xf32>
    %27 = arith.select %25, %26, %19 : vector<8x128xi1>, vector<8x128xf32>
    %c0_17 = arith.constant 0 : index
    %c0_18 = arith.constant 0 : index
    %28 = vector.load %arg8[%c0_17, %c0_18] : memref<8x128xf32, #tpu.memory_space<vmem>>, vector<8x128xf32>
    tpu.vector_store %arg8[%c0_17, %c0_18], %27 {strides = array<i32>} : memref<8x128xf32, #tpu.memory_space<vmem>>, vector<8x128xf32>,
    return
  }
  func.func @transform_0(%arg0: i32) -> (i32, i32) {
    %c0_i32 = arith.constant 0 : i32
    %c0_i32_0 = arith.constant 0 : i32
    return %arg0, %c0_i32 : i32, i32
  }
  func.func @transform_1(%arg0: i32) -> (i32, i32) {
    %c0_i32 = arith.constant 0 : i32
    %c0_i32_0 = arith.constant 0 : i32
    %c0_i32_1 = arith.constant 0 : i32
    return %c0_i32, %c0_i32_0 : i32, i32
  }
  func.func @transform_2(%arg0: i32) -> (i32, i32) {
    %c0_i32 = arith.constant 0 : i32
    %c0_i32_0 = arith.constant 0 : i32
    %c0_i32_1 = arith.constant 0 : i32
    return %c0_i32, %c0_i32_0 : i32, i32
  }
  func.func @transform_3(%arg0: i32) -> (i32, i32) {
    %c0_i32 = arith.constant 0 : i32
    %c0_i32_0 = arith.constant 0 : i32
    %c0_i32_1 = arith.constant 0 : i32
    return %c0_i32, %c0_i32_0 : i32, i32
  }
  func.func @transform_4(%arg0: i32) -> (i32, i32) {
    %c0_i32 = arith.constant 0 : i32
    %c0_i32_0 = arith.constant 0 : i32
    %c0_i32_1 = arith.constant 0 : i32
    return %c0_i32, %c0_i32_0 : i32, i32
  }
  func.func @transform_5(%arg0: i32) -> (i32, i32) {
    %c0_i32 = arith.constant 0 : i32
    %c0_i32_0 = arith.constant 0 : i32
    %c0_i32_1 = arith.constant 0 : i32
    return %c0_i32, %c0_i32_0 : i32, i32
  }
  func.func @transform_6(%arg0: i32) -> (i32, i32) {
    %c0_i32 = arith.constant 0 : i32
    %c0_i32_0 = arith.constant 0 : i32
    %c0_i32_1 = arith.constant 0 : i32
    return %c0_i32, %c0_i32_0 : i32, i32
  }
  func.func @transform_7(%arg0: i32) -> (i32, i32) {
    %c0_i32 = arith.constant 0 : i32
    %c0_i32_0 = arith.constant 0 : i32
    return %arg0, %c0_i32 : i32, i32
  }
}

</mosaic_0001>

<bundles_post_ra>
// kernel: tpu_custom_call.1
= control target key start
LH: loop header
LB: loop body
LE: loop exit
PB: predicated region body
PF: predicated region fallthrough
CT: control target
= control target key end

     0   :  { %12 = vsyncpa [#allocation3], 0  ;;  %s655_s0 = inlined_call_operand.hbm [shape: f32[8,16], index: 0, kind: input, shape index: {}]   ;;  %s656_s1 = inlined_call_operand.hbm [shape: f32[16,256], index: 1, kind: input, shape index: {}]   ;;  %s657_s2 = inlined_call_operand.hbm [shape: f32[1,256], index: 2, kind: input, shape index: {}]   ;;  %s658_s3 = inlined_call_operand.hbm [shape: f32[256,256], index: 3, kind: input, shape index: {}]   ;;  %s659_s4 = inlined_call_operand.vmem [shape: f32[1,256], index: 4, kind: input, shape index: {}]   ;;  %s660_s5 = inlined_call_operand.hbm [shape: f32[256,128], index: 5, kind: input, shape index: {}]   ;;  %s661_s6 = inlined_call_operand.vmem [shape: f32[1,128], index: 6, kind: input, shape index: {}]   ;;  %s662_s7 = inlined_call_operand.hbm [shape: f32[8,128], index: 7, kind: output, shape index: {}]  }
   0x1   :  { %13 = vsyncpa [#allocation6], 0 }
   0x2   :  { %14 = vsyncpa [#allocation9], 0  ;;  %s31_s26 = sshll.u32 %s656_s1, 4  ;;  %s32_s26 = int_to_ptr.hbm [resolvable:$true] %s31_s26 }
   0x3   :  { %15 = vsyncpa [#allocation4], 0  ;;  %s581_s27 = smov [#allocation5]   ;;  %s55_s8 = sshll.u32 %s658_s3, 4  ;;  %s56_s8 = int_to_ptr.hbm [resolvable:$true] %s55_s8 }
   0x4   :  { %s33_s28 = sshll.u32 %s581_s27, 4  ;;  %s582_s9 = smov 256   ;;  %s34_s28 = int_to_ptr.vmem [resolvable:$true] %s33_s28 }
   0x5   :  { %s583_s10 = smov 16   ;;  %s584_s11 = smov [#allocation8]  }
   0x6   :  { %39 = dma.hbm_to_vmem [thread:$0]  %s32_s26, 512, %s34_s28, [#allocation6], %s582_s9, %s582_s9, %s583_s10  }
   0x7   :  { %s57_s12 = sshll.u32 %s584_s11, 4  ;;  %s21_s15 = sshll.u32 %s655_s0, 4  ;;  %s58_s12 = int_to_ptr.vmem [resolvable:$true] %s57_s12  ;;  %s22_s15 = int_to_ptr.hbm [resolvable:$true] %s21_s15 }
   0x8   :  { %63 = dma.hbm_to_vmem [thread:$0]  %s56_s8, 8192, %s58_s12, [#allocation9], %s582_s9, %s582_s9, %s583_s10  }
   0x9   :  { %s45_s17 = sshll.u32 %s657_s2, 4  ;;  %s585_s18 = smov [#allocation2]   ;;  %s46_s17 = int_to_ptr.hbm [resolvable:$true] %s45_s17 }
   0xa   :  { %s23_s19 = sshll.u32 %s585_s18, 4  ;;  %s586_s3 = smov [#allocation7]   ;;  %s24_s19 = int_to_ptr.vmem [resolvable:$true] %s23_s19 }
   0xb   :  { %26 = dma.hbm_to_vmem [thread:$0]  %s22_s15, 128, %s24_s19, [#allocation3]  }
   0xc   :  { %s47_s20 = sshll.u32 %s586_s3, 4  ;;  %s70_s23 = sshll.u32 %s660_s5, 4  ;;  %s48_s20 = int_to_ptr.vmem [resolvable:$true] %s47_s20  ;;  %s71_s23 = int_to_ptr.hbm [resolvable:$true] %s70_s23 }
   0xd   :  { %50 = dma.hbm_to_vmem [thread:$0]  %s46_s17, 32, %s48_s20, [#allocation6]  }
   0xe   :  { %s587_s0 = smov [#allocation10]   ;;  %s588_s25 = smov 128  }
   0xf   :  { %s72_s24 = sshll.u32 %s587_s0, 4  ;;  %s589_s26 = smov 8   ;;  %s73_s24 = int_to_ptr.vmem [resolvable:$true] %s72_s24 }
  0x10   :  { %78 = dma.hbm_to_vmem [thread:$0]  %s71_s23, 4096, %s73_s24, [#allocation9], %s588_s25, %s588_s25, %s589_s26  }
  0x11   :  { %573 = dma.done.wait [#allocation3], 128  }
  0x12   :  { %574 = vsyncadd [#allocation3], 4294967168 }
  0x13   :  { %575 = dma.done.wait [#allocation6], 544  }
  0x14   :  { %576 = vsyncadd [#allocation6], 4294966752 }
  0x15   :  { %577 = dma.done.wait [#allocation9], 12288  }
  0x16   :  { %578 = vsyncadd [#allocation9], 4294955008  ;;  %v104_v0 = vld [vmem:[#allocation5 + $0x10] sm:$0xff]  ;;  %v102_v1 = vld [vmem:[#allocation5] sm:$0xff]  ;;  %vm112_vm0 = vcmask 130048   ;;  %s402_s9 = sshll.u32 %s662_s7, 4  ;;  %s403_s9 = int_to_ptr.hbm [resolvable:$true] %s402_s9 }
  0x17   :  { %v105_v2 = vld [vmem:[#allocation5 + $0x18] sm:$0xff]  ;;  %130 = vmatpush.msra.mxu0 %v104_v0  ;;  %v103_v4 = vld [vmem:[#allocation5 + $0x8] sm:$0xff] }
  0x18   :  { %150 = vmatpush.msra.mxu1 %v105_v2  ;;  %v101_v3 = vld [vmem:[#allocation2] sm:$0xff]  ;;  %v186_v7 = vld [vmem:[#allocation8 + $0xe0] sm:$0xff]  ;;  %v187_v10 = vld [vmem:[#allocation8 + $0xe8] sm:$0xff] }
  0x19   :  { %v188_v5 = vld [vmem:[#allocation8 + $0xf0] sm:$0xff]  ;;  %v189_v6 = vld [vmem:[#allocation8 + $0xf8] sm:$0xff]  ;;  %131 = vmatpush.msra.mxu0 %v102_v1  ;;  %v218_v12 = vld [vmem:[#allocation8 + $0x1e0] sm:$0xff] }
  0x1a   :  { %228 = vmatpush.msra.mxu2 %v188_v5  ;;  %151 = vmatpush.msra.mxu1 %v103_v4  ;;  %v220_v8 = vld [vmem:[#allocation8 + $0x1f0] sm:$0xff]  ;;  %v221_v9 = vld [vmem:[#allocation8 + $0x1f8] sm:$0xff]  ;;  %v219_v13 = vld [vmem:[#allocation8 + $0x1e8] sm:$0xff] }
  0x1b   :  { %414 = vmatmul.msk.f32.vlgmr.msra.gmra.mxu0 %vm112_vm0, %v101_v3  ;;  %415 = vmatmul.msk.f32.vlgmr.msra.gmra.mxu1 %vm112_vm0, %v101_v3  ;;  %v184_v11 = vld [vmem:[#allocation8 + $0xd0] sm:$0xff]  ;;  %v185_v14 = vld [vmem:[#allocation8 + $0xd8] sm:$0xff]  ;;  %v182_v15 = vld [vmem:[#allocation8 + $0xc0] sm:$0xff] }
  0x1c   :  { %268 = vmatpush.msrb.mxu0 %v189_v6  ;;  %229 = vmatpush.msra.mxu2 %v186_v7  ;;  %v216_v16 = vld [vmem:[#allocation8 + $0x1d0] sm:$0xff]  ;;  %v217_v17 = vld [vmem:[#allocation8 + $0x1d8] sm:$0xff]  ;;  %v183_v18 = vld [vmem:[#allocation8 + $0xc8] sm:$0xff] }
  0x1d   :  { %248 = vmatpush.msra.mxu3 %v220_v8  ;;  %288 = vmatpush.msrb.mxu1 %v221_v9  ;;  %v180_v19 = vld [vmem:[#allocation8 + $0xb0] sm:$0xff]  ;;  %v214_v20 = vld [vmem:[#allocation8 + $0x1c0] sm:$0xff]  ;;  %v215_v21 = vld [vmem:[#allocation8 + $0x1c8] sm:$0xff] }
  0x1e   :  { %269 = vmatpush.msrb.mxu0 %v187_v10  ;;  %230 = vmatpush.msra.mxu2 %v184_v11  ;;  %v181_v22 = vld [vmem:[#allocation8 + $0xb8] sm:$0xff]  ;;  %v178_v23 = vld [vmem:[#allocation8 + $0xa0] sm:$0xff]  ;;  %v212_v24 = vld [vmem:[#allocation8 + $0x1b0] sm:$0xff] }
  0x1f   :  { %249 = vmatpush.msra.mxu3 %v218_v12  ;;  %289 = vmatpush.msrb.mxu1 %v219_v13  ;;  %v213_v25 = vld [vmem:[#allocation8 + $0x1b8] sm:$0xff]  ;;  %v179_v26 = vld [vmem:[#allocation8 + $0xa8] sm:$0xff]  ;;  %v176_v27 = vld [vmem:[#allocation8 + $0x90] sm:$0xff] }
  0x20   :  { %270 = vmatpush.msrb.mxu0 %v185_v14  ;;  %231 = vmatpush.msra.mxu2 %v182_v15  ;;  %v210_v28 = vld [vmem:[#allocation8 + $0x1a0] sm:$0xff]  ;;  %v211_v29 = vld [vmem:[#allocation8 + $0x1a8] sm:$0xff]  ;;  %v177_v30 = vld [vmem:[#allocation8 + $0x98] sm:$0xff] }
  0x21   :  { %250 = vmatpush.msra.mxu3 %v216_v16  ;;  %290 = vmatpush.msrb.mxu1 %v217_v17  ;;  %v174_v31 = vld [vmem:[#allocation8 + $0x80] sm:$0xff]  ;;  %v208_v32 = vld [vmem:[#allocation8 + $0x190] sm:$0xff]  ;;  %v209_v33 = vld [vmem:[#allocation8 + $0x198] sm:$0xff] }
  0x22   :  { %271 = vmatpush.msrb.mxu0 %v183_v18  ;;  %232 = vmatpush.msra.mxu2 %v180_v19  ;;  %v175_v34 = vld [vmem:[#allocation8 + $0x88] sm:$0xff]  ;;  %v172_v35 = vld [vmem:[#allocation8 + $0x70] sm:$0xff]  ;;  %v206_v36 = vld [vmem:[#allocation8 + $0x180] sm:$0xff] }
  0x23   :  { %251 = vmatpush.msra.mxu3 %v214_v20  ;;  %291 = vmatpush.msrb.mxu1 %v215_v21  ;;  %v207_v37 = vld [vmem:[#allocation8 + $0x188] sm:$0xff]  ;;  %v173_v38 = vld [vmem:[#allocation8 + $0x78] sm:$0xff]  ;;  %v170_v39 = vld [vmem:[#allocation8 + $0x60] sm:$0xff] }
  0x24   :  { %272 = vmatpush.msrb.mxu0 %v181_v22  ;;  %233 = vmatpush.msra.mxu2 %v178_v23  ;;  %v204_v40 = vld [vmem:[#allocation8 + $0x170] sm:$0xff]  ;;  %v205_v41 = vld [vmem:[#allocation8 + $0x178] sm:$0xff]  ;;  %v171_v42 = vld [vmem:[#allocation8 + $0x68] sm:$0xff] }
  0x25   :  { %252 = vmatpush.msra.mxu3 %v212_v24  ;;  %292 = vmatpush.msrb.mxu1 %v213_v25  ;;  %v168_v43 = vld [vmem:[#allocation8 + $0x50] sm:$0xff]  ;;  %v202_v44 = vld [vmem:[#allocation8 + $0x160] sm:$0xff]  ;;  %v203_v45 = vld [vmem:[#allocation8 + $0x168] sm:$0xff] }
  0x26   :  { %273 = vmatpush.msrb.mxu0 %v179_v26  ;;  %234 = vmatpush.msra.mxu2 %v176_v27  ;;  %v169_v46 = vld [vmem:[#allocation8 + $0x58] sm:$0xff]  ;;  %v166_v47 = vld [vmem:[#allocation8 + $0x40] sm:$0xff]  ;;  %v200_v48 = vld [vmem:[#allocation8 + $0x150] sm:$0xff] }
  0x27   :  { %253 = vmatpush.msra.mxu3 %v210_v28  ;;  %293 = vmatpush.msrb.mxu1 %v211_v29  ;;  %v201_v49 = vld [vmem:[#allocation8 + $0x158] sm:$0xff]  ;;  %v167_v50 = vld [vmem:[#allocation8 + $0x48] sm:$0xff]  ;;  %v164_v51 = vld [vmem:[#allocation8 + $0x30] sm:$0xff] }
  0x28   :  { %274 = vmatpush.msrb.mxu0 %v177_v30  ;;  %235 = vmatpush.msra.mxu2 %v174_v31  ;;  %v198_v52 = vld [vmem:[#allocation8 + $0x140] sm:$0xff]  ;;  %v199_v53 = vld [vmem:[#allocation8 + $0x148] sm:$0xff]  ;;  %v165_v54 = vld [vmem:[#allocation8 + $0x38] sm:$0xff] }
  0x29   :  { %254 = vmatpush.msra.mxu3 %v208_v32  ;;  %294 = vmatpush.msrb.mxu1 %v209_v33  ;;  %v162_v55 = vld [vmem:[#allocation8 + $0x20] sm:$0xff]  ;;  %v196_v56 = vld [vmem:[#allocation8 + $0x130] sm:$0xff]  ;;  %v163_v57 = vld [vmem:[#allocation8 + $0x28] sm:$0xff] }
  0x2a   :  { %275 = vmatpush.msrb.mxu0 %v175_v34  ;;  %236 = vmatpush.msra.mxu2 %v172_v35  ;;  %v197_v58 = vld [vmem:[#allocation8 + $0x138] sm:$0xff]  ;;  %v160_v59 = vld [vmem:[#allocation8 + $0x10] sm:$0xff]  ;;  %v194_v60 = vld [vmem:[#allocation8 + $0x120] sm:$0xff] }
  0x2b   :  { %255 = vmatpush.msra.mxu3 %v206_v36  ;;  %295 = vmatpush.msrb.mxu1 %v207_v37  ;;  %v161_v61 = vld [vmem:[#allocation8 + $0x18] sm:$0xff]  ;;  %v195_v62 = vld [vmem:[#allocation8 + $0x128] sm:$0xff]  ;;  %v158_v63 = vld [vmem:[#allocation8] sm:$0xff] }
  0x2c   :  { %276 = vmatpush.msrb.mxu0 %v173_v38  ;;  %237 = vmatpush.msra.mxu2 %v170_v39  ;;  %v192_v0 = vld [vmem:[#allocation8 + $0x110] sm:$0xff]  ;;  %v159_v1 = vld [vmem:[#allocation8 + $0x8] sm:$0xff]  ;;  %v193_v2 = vld [vmem:[#allocation8 + $0x118] sm:$0xff] }
  0x2d   :  { %256 = vmatpush.msra.mxu3 %v204_v40  ;;  %296 = vmatpush.msrb.mxu1 %v205_v41  ;;  %v190_v3 = vld [vmem:[#allocation8 + $0x100] sm:$0xff]  ;;  %v191_v4 = vld [vmem:[#allocation8 + $0x108] sm:$0xff]  ;;  %v341_v5 = vld [vmem:[#allocation10 + $0xf8] sm:$0xff] }
  0x2e   :  { %277 = vmatpush.msrb.mxu0 %v171_v42  ;;  %238 = vmatpush.msra.mxu2 %v168_v43  ;;  %v340_v6 = vld [vmem:[#allocation10 + $0xf0] sm:$0xff]  ;;  %v325_v7 = vld [vmem:[#allocation10 + $0x78] sm:$0xff]  ;;  %v339_v9 = vld [vmem:[#allocation10 + $0xe8] sm:$0xff] }
  0x2f   :  { %257 = vmatpush.msra.mxu3 %v202_v44  ;;  %297 = vmatpush.msrb.mxu1 %v203_v45  ;;  %v324_v8 = vld [vmem:[#allocation10 + $0x70] sm:$0xff]  ;;  %v323_v10 = vld [vmem:[#allocation10 + $0x68] sm:$0xff]  ;;  %v338_v11 = vld [vmem:[#allocation10 + $0xe0] sm:$0xff] }
  0x30   :  { %278 = vmatpush.msrb.mxu0 %v169_v46  ;;  %239 = vmatpush.msra.mxu2 %v166_v47  ;;  %v322_v12 = vld [vmem:[#allocation10 + $0x60] sm:$0xff]  ;;  %v337_v13 = vld [vmem:[#allocation10 + $0xd8] sm:$0xff]  ;;  %v336_v15 = vld [vmem:[#allocation10 + $0xd0] sm:$0xff] }
  0x31   :  { %258 = vmatpush.msra.mxu3 %v200_v48  ;;  %298 = vmatpush.msrb.mxu1 %v201_v49  ;;  %v321_v14 = vld [vmem:[#allocation10 + $0x58] sm:$0xff]  ;;  %v320_v16 = vld [vmem:[#allocation10 + $0x50] sm:$0xff]  ;;  %v335_v17 = vld [vmem:[#allocation10 + $0xc8] sm:$0xff] }
  0x32   :  { %279 = vmatpush.msrb.mxu0 %v167_v50  ;;  %240 = vmatpush.msra.mxu2 %v164_v51  ;;  %v319_v18 = vld [vmem:[#allocation10 + $0x48] sm:$0xff]  ;;  %v334_v19 = vld [vmem:[#allocation10 + $0xc0] sm:$0xff]  ;;  %v333_v21 = vld [vmem:[#allocation10 + $0xb8] sm:$0xff] }
  0x33   :  { %259 = vmatpush.msra.mxu3 %v198_v52  ;;  %299 = vmatpush.msrb.mxu1 %v199_v53  ;;  %v318_v20 = vld [vmem:[#allocation10 + $0x40] sm:$0xff]  ;;  %v317_v22 = vld [vmem:[#allocation10 + $0x38] sm:$0xff]  ;;  %v332_v23 = vld [vmem:[#allocation10 + $0xb0] sm:$0xff] }
  0x34   :  { %280 = vmatpush.msrb.mxu0 %v165_v54  ;;  %241 = vmatpush.msra.mxu2 %v162_v55  ;;  %v331_v24 = vld [vmem:[#allocation10 + $0xa8] sm:$0xff]  ;;  %v106_v25 = vld [vmem:[#allocation7] sm:$0x3]  ;;  %v330_v26 = vld [vmem:[#allocation10 + $0xa0] sm:$0xff] }
  0x35   :  { %260 = vmatpush.msra.mxu3 %v196_v56  ;;  %300 = vmatpush.msrb.mxu1 %v197_v58  ;;  %v108_v27 = vperm.slane %v106_v25, 0  ;;  %v109_v28 = vperm.slane %v106_v25, 1  ;;  %v316_v35 = vld [vmem:[#allocation10 + $0x30] sm:$0xff]  ;;  %v329_v36 = vld [vmem:[#allocation10 + $0x98] sm:$0xff]  ;;  %v315_v37 = vld [vmem:[#allocation10 + $0x28] sm:$0xff] }
  0x36   :  { %281 = vmatpush.msrb.mxu0 %v163_v57  ;;  %242 = vmatpush.msra.mxu2 %v160_v59  ;;  %v328_v38 = vld [vmem:[#allocation10 + $0x90] sm:$0xff]  ;;  %v314_v39 = vld [vmem:[#allocation10 + $0x20] sm:$0xff]  ;;  %v327_v40 = vld [vmem:[#allocation10 + $0x88] sm:$0xff] }
  0x37   :  { %261 = vmatpush.msra.mxu3 %v194_v60  ;;  %301 = vmatpush.msrb.mxu1 %v195_v62  ;;  %v313_v41 = vld [vmem:[#allocation10 + $0x18] sm:$0xff]  ;;  %v326_v42 = vld [vmem:[#allocation10 + $0x80] sm:$0xff]  ;;  %v312_v43 = vld [vmem:[#allocation10 + $0x10] sm:$0xff] }
  0x38   :  { %282 = vmatpush.msrb.mxu0 %v161_v61  ;;  %243 = vmatpush.msra.mxu2 %v158_v63  ;;  %v311_v44 = vld [vmem:[#allocation10 + $0x8] sm:$0xff]  ;;  %v310_v45 = vld [vmem:[#allocation10] sm:$0xff]  ;;  %v222_v46 = vld [vmem:[%s659_s4] sm:$0x3]  ;;  %v386_v61 = vlaneseq  ;;  %s590_s4 = smov [#allocation11]  }
  0x39   :  { %262 = vmatpush.msra.mxu3 %v192_v0  ;;  %302 = vmatpush.msrb.mxu1 %v193_v2  ;;  %v225_v47 = vperm.slane %v222_v46, 1  ;;  %v224_v52 = vperm.slane %v222_v46, 0  ;;  %v426_v59 = vld [vmem:[%s661_s6] ss:$0 sm:$0xff]  ;;  %s400_s29 = sshll.u32 %s590_s4, 4  ;;  %s401_s29 = int_to_ptr.vmem [resolvable:$true] %s400_s29 }
  0x3a   :  { %283 = vmatpush.msrb.mxu0 %v159_v1  ;;  %346 = vmatpush.msrb.mxu2 %v325_v7  ;;  %v387_v1 = vand.u32 127, %v386_v61 }
  0x3b   :  { %263 = vmatpush.msra.mxu3 %v190_v3  ;;  %303 = vmatpush.msrb.mxu1 %v191_v4 }
  0x3c   :  { %347 = vmatpush.msrb.mxu2 %v324_v8  ;;  %vm388_vm1 = vcmp.ge.s32.totalorder %v387_v1, 4  ;;  %vm389_vm2 = vcmp.lt.s32.totalorder %v387_v1, 8 }
  0x3d   :  { %366 = vmatpush.msrb.mxu3 %v341_v5  ;;  %vm390_vm3 = vmand %vm388_vm1, %vm389_vm2 }
  0x3e   :  { %348 = vmatpush.msrb.mxu2 %v323_v10 }
  0x3f   :  { %367 = vmatpush.msrb.mxu3 %v340_v6 }
  0x40   :  { %349 = vmatpush.msrb.mxu2 %v322_v12 }
  0x41   :  { %368 = vmatpush.msrb.mxu3 %v339_v9 }
  0x42   :  { %350 = vmatpush.msrb.mxu2 %v321_v14 }
  0x43   :  { %369 = vmatpush.msrb.mxu3 %v338_v11 }
  0x44   :  { %351 = vmatpush.msrb.mxu2 %v320_v16 }
  0x45   :  { %370 = vmatpush.msrb.mxu3 %v337_v13 }
  0x46   :  { %352 = vmatpush.msrb.mxu2 %v319_v18 }
  0x47   :  { %371 = vmatpush.msrb.mxu3 %v336_v15 }
  0x48   :  { %353 = vmatpush.msrb.mxu2 %v318_v20 }
  0x49   :  { %372 = vmatpush.msrb.mxu3 %v335_v17 }
  0x4a   :  { %354 = vmatpush.msrb.mxu2 %v317_v22 }
  0x4b   :  { %373 = vmatpush.msrb.mxu3 %v334_v19 }
  0x4c   :  { %355 = vmatpush.msrb.mxu2 %v316_v35 }
  0x4d   :  { %374 = vmatpush.msrb.mxu3 %v333_v21 }
  0x4e   :  { %356 = vmatpush.msrb.mxu2 %v315_v37 }
  0x4f   :  { %375 = vmatpush.msrb.mxu3 %v332_v23 }
  0x50   :  { %357 = vmatpush.msrb.mxu2 %v314_v39 }
  0x51   :  { %376 = vmatpush.msrb.mxu3 %v331_v24 }
  0x52   :  { %358 = vmatpush.msrb.mxu2 %v313_v41 }
  0x53   :  { %377 = vmatpush.msrb.mxu3 %v330_v26 }
  0x54   :  { %359 = vmatpush.msrb.mxu2 %v312_v43 }
  0x55   :  { %378 = vmatpush.msrb.mxu3 %v329_v36 }
  0x56   :  { %360 = vmatpush.msrb.mxu2 %v311_v44 }
  0x57   :  { %379 = vmatpush.msrb.mxu3 %v328_v38 }
  0x58   :  { %361 = vmatpush.msrb.mxu2 %v310_v45 }
  0x59   :  { %380 = vmatpush.msrb.mxu3 %v327_v40 }
  0x5b   :  { %381 = vmatpush.msrb.mxu3 %v326_v42 }
  0x98   :  { %v133_v29 = vpop.f32.mrf.mxu0  ;;  %v153_v30 = vpop.f32.mrf.mxu1 }
  0x99   :  { %v134_v31 = vadd.f32 %v133_v29, %v108_v27  ;;  %v154_v32 = vadd.f32 %v153_v30, %v109_v28 }
  0x9b   :  { %v156_v33 = vmax.f32 %v134_v31, 0.0  ;;  %v157_v34 = vmax.f32 %v154_v32, 0.0 }
  0x9d   :  { %244 = vmatmul.f32.vlgmr.msra.gmra.mxu2 %v156_v33  ;;  %284 = vmatmul.f32.vlgmr.msrb.gmra.mxu0 %v156_v33 }
  0x9e   :  { %264 = vmatmul.f32.vlgmr.msra.gmra.mxu3 %v157_v34  ;;  %304 = vmatmul.f32.vlgmr.msrb.gmra.mxu1 %v157_v34 }
 0x11a   :  { %v285_v48 = vpop.f32.mrf.mxu0 }
 0x11b   :  { %v286_v49 = vadd.f32 %v285_v48, %v225_v47  ;;  %v305_v50 = vpop.f32.mrf.mxu1 }
 0x11d   :  { %v306_v51 = vadd.f32 %v305_v50, %v286_v49 }
 0x11f   :  { %v309_v53 = vmax.f32 %v306_v51, 0.0 }
 0x120   :  { %v245_v54 = vpop.f32.mrf.mxu2 }
 0x121   :  { %v246_v55 = vadd.f32 %v245_v54, %v224_v52  ;;  %382 = vmatmul.f32.vlgmr.msrb.gmra.mxu3 %v309_v53  ;;  %v265_v56 = vpop.f32.mrf.mxu3 }
 0x123   :  { %v266_v57 = vadd.f32 %v265_v56, %v246_v55 }
 0x125   :  { %v308_v58 = vmax.f32 %v266_v57, 0.0 }
 0x127   :  { %362 = vmatmul.f32.vlgmr.msrb.gmra.mxu2 %v308_v58 }
 0x1a4   :  { %v383_v63 = vpop.f32.mrf.mxu3 }
 0x1aa   :  { %v363_v60 = vpop.f32.mrf.mxu2 }
 0x1ab   :  { %v364_v62 = vadd.f32 %v426_v59, %v363_v60 }
 0x1ad   :  { %v384_v0 = vadd.f32 %v383_v63, %v364_v62 }
 0x1af   :  { %v391_v2 = vmul.f32 1.442695, %v384_v0 }
 0x1b1   :  { %427 = vpow2.f32 %v391_v2 }
 0x1b7   :  { %v428_v3 = vpop.eup %427 }
 0x1b8   :  { %v393_v4 = vsel %vm390_vm3, %v428_v3, %v384_v0 }
 0x1b9   :  { %394 = vst [vmem:[#allocation11] sm:$0xff] %v393_v4 }
 0x1ba   :  { %405 = dma.vmem_to_hbm [thread:$0]  %s401_s29, 128, %s403_s9, [#allocation4]  }
 0x1bb   :  { %579 = dma.done.wait [#allocation4], 128  }
 0x1bc   :  { %580 = vsyncadd [#allocation4], 4294967168 }
 0x1bd   :  { %410 = vsyncpa [#allocation3], 1 }
 0x1be   :  { %411 = vsyncpa [#allocation6], 1 }
 0x1bf   :  { %412 = vsyncpa [#allocation9], 1 }
 0x1c0   :  { %413 = vsyncpa [#allocation4], 1 }

</bundles_post_ra>
